<compile_context>
chip_gen: v7x
topology: tpu7x:2x2x1
jax: 0.10.0
libtpu: 0.0.40
codegen_flags: <defaults>
</compile_context>

<pallas_src>
import functools

import jax
import jax.numpy as jnp
from jax.experimental import pallas as pl
from jax.experimental.pallas import tpu as pltpu

_LANE = 512  # lane-dense last axis (multiple of 128) for the flattened view


def _h_sigmoid_kernel(x_ref, o_ref, *, h_max, compute_dtype):
    # x_ref / o_ref: (rt, _LANE) tiles.
    x = x_ref[...].astype(compute_dtype)
    # h_sigmoid(x) = relu6(x + 3) * h_max / 6
    y = jnp.clip(x + 3.0, 0.0, 6.0) * (h_max / 6.0)
    o_ref[...] = y.astype(o_ref.dtype)


def h_sigmoid_pallas(x, h_max=1.0):
    """Elementwise h_sigmoid over a tensor of any shape/dtype (f32 or bf16)."""
    orig_shape = x.shape
    dtype = x.dtype
    n = x.size
    itemsize = jnp.dtype(dtype).itemsize

    # Native bf16 apply on v6e/v7x; upcast to f32 on v5e (no bf16 VALU).
    kind = jax.devices()[0].device_kind.lower()
    if dtype == jnp.float32 or "v5" in kind:
        compute_dtype = jnp.float32
    else:
        compute_dtype = dtype

    # Flatten to a lane-dense 2D view: (rows, _LANE).
    rows = pl.cdiv(n, _LANE)
    rows_pad8 = ((rows + 7) // 8) * 8

    # Row tile: ~2 MiB of input per block (measured sweet spot for mem-bound
    # elementwise kernels), multiple of 8 sublanes.
    target_rows = max(8, ((2 << 20) // (_LANE * itemsize)) // 8 * 8)
    rt = min(target_rows, rows_pad8)
    # Prefer >= 2 grid steps so the "parallel" axis feeds both TCs on v7x.
    if rt >= rows_pad8 and rows_pad8 >= 16:
        rt = ((rows_pad8 // 2 + 7) // 8) * 8
    grid_r = pl.cdiv(rows_pad8, rt)
    padded_rows = grid_r * rt
    pad = padded_rows * _LANE - n

    x2d = jnp.pad(x.reshape(-1), (0, pad)).reshape(padded_rows, _LANE)

    # VMEM: double-buffered in + out tiles + 1 MiB headroom, capped at 75% of
    # the physical per-core VMEM (leaves compiler scratch room on v7x).
    tile_bytes = rt * _LANE * itemsize
    need = 2 * 2 * tile_bytes + (1 << 20)
    try:
        vmem_cap = int(pltpu.get_tpu_info().vmem_capacity_bytes)
    except Exception:
        vmem_cap = 64 << 20
    vmem_limit = int(min(max(need, 16 << 20), (vmem_cap * 3) // 4))

    out2d = pl.pallas_call(
        functools.partial(_h_sigmoid_kernel, h_max=float(h_max),
                          compute_dtype=compute_dtype),
        out_shape=jax.ShapeDtypeStruct((padded_rows, _LANE), dtype),
        grid=(grid_r,),
        in_specs=[pl.BlockSpec((rt, _LANE), lambda r: (r, 0))],
        out_specs=pl.BlockSpec((rt, _LANE), lambda r: (r, 0)),
        compiler_params=pltpu.CompilerParams(
            dimension_semantics=("parallel",),   # megacore sharding on v7x
            vmem_limit_bytes=vmem_limit,
        ),
    )(x2d)

    return out2d.reshape(-1)[:n].reshape(orig_shape)


def h_sigmoid_reference(x, h_max=1.0):
    """Pure-JAX f32 reference mirroring the PyTorch forward."""
    xf = x.astype(jnp.float32)
    return jnp.clip(xf + 3.0, 0.0, 6.0) * h_max / 6.0


if __name__ == "__main__":
    key = jax.random.PRNGKey(0)
    k1, k2 = jax.random.split(key)

    # ---- f32, lane-friendly shape (B, C, H, W) = (2, 8, 16, 16) ----
    x = jax.random.normal(k1, (2, 8, 16, 16), dtype=jnp.float32) * 4.0
    out = jax.block_until_ready(h_sigmoid_pallas(x))
    ref = h_sigmoid_reference(x)
    assert out.shape == x.shape and out.dtype == x.dtype
    assert jnp.allclose(out, ref, atol=1e-6, rtol=1e-6), "f32 mismatch"

    # ---- bf16 + awkward spatial size (H=W=7): exercises the pad path ----
    xb = (jax.random.normal(k2, (2, 4, 7, 7), dtype=jnp.float32) * 4.0
          ).astype(jnp.bfloat16)
    outb = jax.block_until_ready(h_sigmoid_pallas(xb))
    refb = h_sigmoid_reference(xb)
    assert outb.shape == xb.shape and outb.dtype == jnp.bfloat16
    assert jnp.allclose(outb.astype(jnp.float32), refb,
                        atol=3e-2, rtol=3e-2), "bf16 mismatch"

    print("KERNEL_OK")
</pallas_src>

<mosaic_0001>
module attributes {stable_mosaic.version = 11 : i64} {
  func.func @_h_sigmoid_kernel(%arg0: i32, %arg1: memref<8x512xf32, #tpu.memory_space<vmem>>, %arg2: memref<8x512xf32, #tpu.memory_space<vmem>>) attributes {dimension_semantics = [#tpu.dimension_semantics<parallel>], iteration_bounds = array<i64: 1>, scalar_prefetch = 0 : i64, scratch_operands = 0 : i64, tpu.core_type = #tpu.core_type<tc>, window_params = [{transform_indices = @transform_0, window_bounds = array<i64: 8, 512>}, {transform_indices = @transform_1, window_bounds = array<i64: 8, 512>}]} {
    %c0 = arith.constant 0 : index
    %c0_0 = arith.constant 0 : index
    %0 = vector.load %arg1[%c0, %c0_0] : memref<8x512xf32, #tpu.memory_space<vmem>>, vector<8x512xf32>
    %cst = arith.constant 3.000000e+00 : f32
    %1 = vector.broadcast %cst : f32 to vector<8x512xf32>
    %2 = arith.addf %0, %1 : vector<8x512xf32>
    %cst_1 = arith.constant 0.000000e+00 : f32
    %cst_2 = arith.constant 6.000000e+00 : f32
    %3 = vector.broadcast %cst_1 : f32 to vector<8x512xf32>
    %4 = arith.maximumf %3, %2 : vector<8x512xf32>
    %5 = vector.broadcast %cst_2 : f32 to vector<8x512xf32>
    %6 = arith.minimumf %5, %4 : vector<8x512xf32>
    %cst_3 = arith.constant 0.166666672 : f32
    %7 = vector.broadcast %cst_3 : f32 to vector<8x512xf32>
    %8 = arith.mulf %6, %7 : vector<8x512xf32>
    %c0_4 = arith.constant 0 : index
    %c0_5 = arith.constant 0 : index
    %9 = vector.load %arg2[%c0_4, %c0_5] : memref<8x512xf32, #tpu.memory_space<vmem>>, vector<8x512xf32>
    tpu.vector_store %arg2[%c0_4, %c0_5], %8 {strides = array<i32>} : memref<8x512xf32, #tpu.memory_space<vmem>>, vector<8x512xf32>,
    return
  }
  func.func @transform_0(%arg0: i32) -> (i32, i32) {
    %c0_i32 = arith.constant 0 : i32
    %c0_i32_0 = arith.constant 0 : i32
    return %arg0, %c0_i32 : i32, i32
  }
  func.func @transform_1(%arg0: i32) -> (i32, i32) {
    %c0_i32 = arith.constant 0 : i32
    %c0_i32_0 = arith.constant 0 : i32
    return %arg0, %c0_i32 : i32, i32
  }
}

</mosaic_0001>

<bundles_post_ra>
// kernel: tpu_custom_call.1
= control target key start
LH: loop header
LB: loop body
LE: loop exit
PB: predicated region body
PF: predicated region fallthrough
CT: control target
= control target key end

     0   :  { %6 = vsyncpa [#allocation3], 0  ;;  %s146_s0 = inlined_call_operand.hbm [shape: f32[8,512], index: 0, kind: input, shape index: {}]   ;;  %s147_s1 = inlined_call_operand.hbm [shape: f32[8,512], index: 1, kind: output, shape index: {}]  }
   0x1   :  { %7 = vsyncpa [#allocation4], 0  ;;  %s110_s6 = smov [#allocation2]   ;;  %s62_s10 = scalar_lea.hbm %s146_s0, 512 }
   0x2   :  { %s14_s7 = sshll.u32 %s110_s6, 4  ;;  %p63_p0 = scmp.ne.s32.totalorder %s146_s0, %s62_s10  ;;  %s15_s7 = int_to_ptr.vmem [resolvable:$true] %s14_s7 }
   0x3   :  { %p66_p1 = scmp.lt.u32.totalorder %s62_s10, %s146_s0 }
   0x5   :  { %p68_p2 = pnand %p66_p1, %p63_p0 }
   0x7   :  { %71 = shalt.err (!%p68_p2)
}
   0x8   :  { %s72_s15 = scalar_lea.vmem %s15_s7, 512  ;;  %p77_p4 = scmp.lt.s32.totalorder %s15_s7, %s15_s7 }
   0x9   :  { %p73_p3 = scmp.ne.s32.totalorder %s15_s7, %s72_s15  ;;  %p78_p5 = scmp.lt.s32.totalorder %s72_s15, %s72_s15 }
   0xb   :  { %p79_p6 = por %p78_p5, %p77_p4 }
   0xd   :  { %p80_p7 = pnand %p79_p6, %p73_p3 }
   0xf   :  { %83 = shalt.err (!%p80_p7)
}
  0x10   :  { %17 = dma.hbm_to_vmem [thread:$0]  %s146_s0, 512, %s15_s7, [#allocation3]  }
  0x11   :  { %106 = dma.done.wait [#allocation3], 512  }
  0x12   :  { %107 = vsyncadd [#allocation3], 4294966784  ;;  %v21_v0 = vld [vmem:[#allocation2] sm:$0xff]  ;;  %v22_v1 = vld [vmem:[#allocation2 + $0x8] sm:$0xff]  ;;  %s111_s18 = smov [#allocation5]  }
  0x13   :  { %v23_v2 = vld [vmem:[#allocation2 + $0x10] sm:$0xff]  ;;  %v25_v3 = vadd.f32 3.0, %v21_v0  ;;  %v26_v4 = vadd.f32 3.0, %v22_v1  ;;  %v24_v6 = vld [vmem:[#allocation2 + $0x18] sm:$0xff]  ;;  %s51_s19 = sshll.u32 %s111_s18, 4  ;;  %s52_s19 = int_to_ptr.vmem [resolvable:$true] %s51_s19 }
  0x14   :  { %v27_v5 = vadd.f32 3.0, %v23_v2  ;;  %v28_v7 = vadd.f32 3.0, %v24_v6  ;;  %s84_s0 = scalar_lea.vmem %s52_s19, 512  ;;  %p89_p9 = scmp.lt.s32.totalorder %s52_s19, %s52_s19 }
  0x15   :  { %v29_v8 = vmax.f32 %v25_v3, 0.0  ;;  %v30_v9 = vmax.f32 %v26_v4, 0.0  ;;  %p85_p8 = scmp.ne.s32.totalorder %s52_s19, %s84_s0  ;;  %p90_p10 = scmp.lt.s32.totalorder %s84_s0, %s84_s0 }
  0x16   :  { %v31_v10 = vmax.f32 %v27_v5, 0.0  ;;  %v32_v11 = vmax.f32 %v28_v7, 0.0 }
  0x17   :  { %v33_v12 = vmin.f32 %v29_v8, 6.0  ;;  %v34_v13 = vmin.f32 %v30_v9, 6.0  ;;  %p91_p11 = por %p90_p10, %p89_p9 }
  0x18   :  { %v35_v14 = vmin.f32 %v31_v10, 6.0  ;;  %v36_v15 = vmin.f32 %v32_v11, 6.0 }
  0x19   :  { %v37_v16 = vmul.f32 0.16666667, %v33_v12  ;;  %v38_v17 = vmul.f32 0.16666667, %v34_v13  ;;  %p92_p12 = pnand %p91_p11, %p85_p8 }
  0x1a   :  { %v39_v18 = vmul.f32 0.16666667, %v35_v14  ;;  %v40_v19 = vmul.f32 0.16666667, %v36_v15 }
  0x1b   :  { %41 = vst [vmem:[#allocation5] sm:$0xff] %v37_v16  ;;  %42 = vst [vmem:[#allocation5 + $0x8] sm:$0xff] %v38_v17 }
  0x1c   :  { %43 = vst [vmem:[#allocation5 + $0x10] sm:$0xff] %v39_v18  ;;  %44 = vst [vmem:[#allocation5 + $0x18] sm:$0xff] %v40_v19 }
  0x1d   :  { %95 = shalt.err (!%p92_p12)
}
  0x1e   :  { %s96_s22 = scalar_lea.hbm %s147_s1, 512 }
  0x1f   :  { %p97_p13 = scmp.ne.s32.totalorder %s147_s1, %s96_s22  ;;  %p100_p0 = scmp.lt.u32.totalorder %s96_s22, %s147_s1 }
  0x21   :  { %p102_p1 = pnand %p100_p0, %p97_p13 }
  0x23   :  { %105 = shalt.err (!%p102_p1)
}
  0x24   :  { %54 = dma.vmem_to_hbm [thread:$0]  %s52_s19, 512, %s147_s1, [#allocation4]  }
  0x25   :  { %108 = dma.done.wait [#allocation4], 512  }
  0x26   :  { %109 = vsyncadd [#allocation4], 4294966784 }
  0x27   :  { %58 = vsyncpa [#allocation3], 1 }
  0x28   :  { %59 = vsyncpa [#allocation4], 1 }

</bundles_post_ra>
